<compile_context>
chip_gen: v7x
topology: tpu7x:2x2x1
jax: 0.10.0
libtpu: 0.0.40
codegen_flags: <defaults>
</compile_context>

<pallas_src>
import functools

import jax
import jax.numpy as jnp
from jax import lax
from jax.experimental import pallas as pl
from jax.experimental.pallas import tpu as pltpu

EPS = 1e-5     # BatchNorm eps (PyTorch default)
SLOPE = 0.2    # LeakyReLU negative slope


def _leaky(v):
    return jnp.where(v > 0, v, SLOPE * v)


# ----------------------------------------------------------------------------
# Fused ResBlock kernel.
#   x_ref   : (1, R, Cin)  zero-halo flattened input for one image
#   mask_ref: (R, 1)       1.0 on real pixels, 0.0 on halo rows
#   w*/b*   : folded Conv+BN weights (w2 as (9, Cc, Cc) -- one matrix per tap)
#   o_ref   : (1, R, Cout) zero-halo flattened output
#   y1g_ref : VMEM scratch (R + 2*Wp + 2, Cc) -- guarded staging for the taps
# ----------------------------------------------------------------------------
def _resblock_kernel(*refs, R, Wp, has_proj):
    if has_proj:
        (x_ref, mask_ref, w1_ref, b1_ref, w2_ref, b2_ref,
         w3_ref, b3_ref, wr_ref, br_ref, o_ref, y1g_ref) = refs
    else:
        (x_ref, mask_ref, w1_ref, b1_ref, w2_ref, b2_ref,
         w3_ref, b3_ref, o_ref, y1g_ref) = refs

    x = x_ref[0]            # (R, Cin) -- halo rows are exactly zero
    mask = mask_ref[...]    # (R, 1)

    # conv1 (1x1) + folded BN + LeakyReLU; re-zero halo rows so the 3x3 stage
    # sees proper 'same' zero padding.
    y1 = _leaky(jnp.dot(x, w1_ref[...], preferred_element_type=jnp.float32)
                + b1_ref[...]) * mask

    # conv2 (3x3 'same') as 9 constant row shifts: stage y1 in a guarded
    # scratch (Wp+1 zero guard rows on each side), then accumulate 9 shifted
    # matmuls in registers (single K step -> no accumulator scratch needed).
    y1g_ref[...] = jnp.zeros_like(y1g_ref)
    y1g_ref[pl.ds(Wp + 1, R), :] = y1
    acc = jnp.dot(y1g_ref[pl.ds(0, R), :], w2_ref[0],
                  preferred_element_type=jnp.float32)
    for t in range(1, 9):
        dy, dx = divmod(t, 3)
        acc = acc + jnp.dot(y1g_ref[pl.ds(dy * Wp + dx, R), :], w2_ref[t],
                            preferred_element_type=jnp.float32)
    y2 = _leaky(acc + b2_ref[...])

    # conv3 (1x1) + folded BN, residual add, final LeakyReLU; halo rows are
    # re-zeroed so the next block's input keeps the zero-halo invariant.
    y3 = jnp.dot(y2, w3_ref[...], preferred_element_type=jnp.float32) + b3_ref[...]
    if has_proj:
        res = (jnp.dot(x, wr_ref[...], preferred_element_type=jnp.float32)
               + br_ref[...])
    else:
        res = x
    o_ref[0] = (_leaky(y3 + res) * mask).astype(o_ref.dtype)


def resblock_pallas(xflat, mask, p, *, Wp):
    N, R, cin = xflat.shape
    cc = p["w1"].shape[1]
    cout = p["w3"].shape[1]
    has_proj = "wr" in p

    c2 = lambda n: (0, 0)
    c3 = lambda n: (0, 0, 0)
    in_specs = [
        pl.BlockSpec((1, R, cin), lambda n: (n, 0, 0)),   # x (one image / step)
        pl.BlockSpec((R, 1), c2),                         # halo mask
        pl.BlockSpec((cin, cc), c2),                      # w1 (folded)
        pl.BlockSpec((1, cc), c2),                        # b1
        pl.BlockSpec((9, cc, cc), c3),                    # w2 (folded, per tap)
        pl.BlockSpec((1, cc), c2),                        # b2
        pl.BlockSpec((cc, cout), c2),                     # w3 (folded)
        pl.BlockSpec((1, cout), c2),                      # b3
    ]
    args = [xflat, mask, p["w1"], p["b1"], p["w2"], p["b2"], p["w3"], p["b3"]]
    if has_proj:
        in_specs += [pl.BlockSpec((cin, cout), c2),       # wr (projection)
                     pl.BlockSpec((1, cout), c2)]         # br
        args += [p["wr"], p["br"]]

    return pl.pallas_call(
        functools.partial(_resblock_kernel, R=R, Wp=Wp, has_proj=has_proj),
        out_shape=jax.ShapeDtypeStruct((N, R, cout), xflat.dtype),
        grid_spec=pltpu.PrefetchScalarGridSpec(
            num_scalar_prefetch=0,
            grid=(N,),
            in_specs=in_specs,
            out_specs=pl.BlockSpec((1, R, cout), lambda n: (n, 0, 0)),
            scratch_shapes=[pltpu.VMEM((R + 2 * Wp + 2, cc), jnp.float32)],
        ),
        compiler_params=pltpu.CompilerParams(
            dimension_semantics=("parallel",)),
    )(*args)


def conv5_forward_pallas(x_nchw, params):
    n = x_nchw.shape[0]
    x = jnp.transpose(x_nchw, (0, 2, 3, 1))          # NCHW -> NHWC
    s = params[0]["stride"]
    xs = x[:, ::s, ::s, :]                           # k=1 stride-s conv == subsample
    _, ho, wo, cin = xs.shape
    hp, wp = ho + 2, wo + 2
    R = hp * wp

    # zero-halo, flattened layout shared by every block (only the halo bytes
    # are padded -- no K/N padding, no im2col materialization).
    xflat = jnp.pad(xs, ((0, 0), (1, 1), (1, 1), (0, 0))).reshape(n, R, cin)

    rows = jnp.arange(R, dtype=jnp.int32)
    mask = (((rows // wp) >= 1) & ((rows // wp) <= ho) &
            ((rows % wp) >= 1) & ((rows % wp) <= wo)).astype(xflat.dtype)[:, None]

    for p in params:
        xflat = resblock_pallas(xflat, mask, p, Wp=wp)

    cout = xflat.shape[-1]
    out = xflat.reshape(n, hp, wp, cout)[:, 1:ho + 1, 1:wo + 1, :]
    return jnp.transpose(out, (0, 3, 1, 2))          # NHWC -> NCHW


# ----------------------------------------------------------------------------
# Deterministic parameter construction + Conv/BN folding (done once, off the
# hot path).
# ----------------------------------------------------------------------------
def _bn_params(key, c):
    k1, k2, k3, k4 = jax.random.split(key, 4)
    return dict(
        gamma=1.0 + 0.1 * jax.random.normal(k1, (c,), jnp.float32),
        beta=0.1 * jax.random.normal(k2, (c,), jnp.float32),
        mean=0.1 * jax.random.normal(k3, (c,), jnp.float32),
        var=jnp.abs(jax.random.normal(k4, (c,), jnp.float32)) + 0.5,
    )


def init_resblock_raw(key, in_ch, out_ch, stride, bottleneck):
    cc = out_ch // 4 if bottleneck else out_ch
    ks = jax.random.split(key, 12)
    cw = lambda k, shape: 0.05 * jax.random.normal(k, shape, jnp.float32)
    cb = lambda k, c: 0.02 * jax.random.normal(k, (c,), jnp.float32)
    p = {"stride": stride, "bottleneck": bottleneck,
         "w1": cw(ks[0], (1, 1, in_ch, cc)), "b1": cb(ks[1], cc),
         "bn1": _bn_params(ks[2], cc),
         "w2": cw(ks[3], (3, 3, cc, cc)), "b2": cb(ks[4], cc),
         "bn2": _bn_params(ks[5], cc),
         "w3": cw(ks[6], (1, 1, cc, out_ch)), "b3": cb(ks[7], out_ch),
         "bn3": _bn_params(ks[8], out_ch)}
    if bottleneck:
        p["wr"] = cw(ks[9], (1, 1, in_ch, out_ch))
        p["br"] = cb(ks[10], out_ch)
        p["bnr"] = _bn_params(ks[11], out_ch)
    return p


def init_conv5_raw(key, in_ch, out_ch, layer_nums):
    keys = jax.random.split(key, layer_nums)
    blocks = [init_resblock_raw(keys[0], in_ch, out_ch, stride=2, bottleneck=True)]
    for i in range(1, layer_nums):
        blocks.append(init_resblock_raw(keys[i], out_ch, out_ch,
                                        stride=1, bottleneck=False))
    return blocks


def _fold(w_hwio, b, bn):
    scale = bn["gamma"] / jnp.sqrt(bn["var"] + EPS)
    return w_hwio * scale, (b - bn["mean"]) * scale + bn["beta"]


def fold_block(raw):
    """Fold Conv+BN pairs and pre-shape everything for the Pallas kernel."""
    w1, b1 = _fold(raw["w1"], raw["b1"], raw["bn1"])
    w2, b2 = _fold(raw["w2"], raw["b2"], raw["bn2"])
    w3, b3 = _fold(raw["w3"], raw["b3"], raw["bn3"])
    cc = w2.shape[2]
    p = {"stride": raw["stride"],
         "w1": w1[0, 0], "b1": b1[None, :],
         "w2": w2.reshape(9, cc, w2.shape[3]), "b2": b2[None, :],
         "w3": w3[0, 0], "b3": b3[None, :]}
    if raw["bottleneck"]:
        wr, br = _fold(raw["wr"], raw["br"], raw["bnr"])
        p["wr"] = wr[0, 0]
        p["br"] = br[None, :]
    return p


# ----------------------------------------------------------------------------
# Pure-JAX reference (independent: lax.conv + explicit eval-mode BatchNorm).
# ----------------------------------------------------------------------------
def _ref_conv(x, w_hwio, b, stride=1, padding="VALID"):
    y = lax.conv_general_dilated(x, w_hwio, window_strides=(stride, stride),
                                 padding=padding,
                                 dimension_numbers=("NHWC", "HWIO", "NHWC"))
    return y + b


def _ref_bn(x, bn):
    return (x - bn["mean"]) / jnp.sqrt(bn["var"] + EPS) * bn["gamma"] + bn["beta"]


def ref_resblock(x, raw):
    s = raw["stride"]
    y = _leaky(_ref_bn(_ref_conv(x, raw["w1"], raw["b1"], stride=s), raw["bn1"]))
    y = _leaky(_ref_bn(_ref_conv(y, raw["w2"], raw["b2"], padding="SAME"),
                       raw["bn2"]))
    y = _ref_bn(_ref_conv(y, raw["w3"], raw["b3"]), raw["bn3"])
    if raw["bottleneck"]:
        r = _ref_bn(_ref_conv(x, raw["wr"], raw["br"], stride=s), raw["bnr"])
    else:
        r = x
    return _leaky(y + r)


def ref_conv5(x_nchw, raw_blocks):
    x = jnp.transpose(x_nchw, (0, 2, 3, 1))
    for raw in raw_blocks:
        x = ref_resblock(x, raw)
    return jnp.transpose(x, (0, 3, 1, 2))


# ----------------------------------------------------------------------------
if __name__ == "__main__":
    key = jax.random.PRNGKey(0)
    kx, kp = jax.random.split(key)

    # Small shapes consistent with the module: Conv5(in=16, out=32, layers=3)
    in_ch, out_ch, layer_nums = 16, 32, 3
    x = jax.random.normal(kx, (2, in_ch, 8, 8), jnp.float32)   # NCHW input

    raw_params = init_conv5_raw(kp, in_ch, out_ch, layer_nums)
    folded_params = [fold_block(b) for b in raw_params]

    out = conv5_forward_pallas(x, folded_params)
    out = jax.block_until_ready(out)
    assert out.shape == (2, out_ch, 4, 4), out.shape

    ref = ref_conv5(x, raw_params)
    err = float(jnp.max(jnp.abs(out - ref)))
    assert jnp.allclose(out, ref, rtol=1e-3, atol=1e-3), err

    print("KERNEL_OK")
</pallas_src>

<mosaic_0001>
module attributes {stable_mosaic.version = 11 : i64} {
  func.func @_resblock_kernel(%arg0: i32, %arg1: memref<1x36x16xf32, #tpu.memory_space<vmem>>, %arg2: memref<36x1xf32, #tpu.memory_space<vmem>>, %arg3: memref<16x8xf32, #tpu.memory_space<vmem>>, %arg4: memref<1x8xf32, #tpu.memory_space<vmem>>, %arg5: memref<9x8x8xf32, #tpu.memory_space<vmem>>, %arg6: memref<1x8xf32, #tpu.memory_space<vmem>>, %arg7: memref<8x32xf32, #tpu.memory_space<vmem>>, %arg8: memref<1x32xf32, #tpu.memory_space<vmem>>, %arg9: memref<16x32xf32, #tpu.memory_space<vmem>>, %arg10: memref<1x32xf32, #tpu.memory_space<vmem>>, %arg11: memref<1x36x32xf32, #tpu.memory_space<vmem>>, %arg12: memref<50x8xf32, #tpu.memory_space<vmem>>) attributes {dimension_semantics = [#tpu.dimension_semantics<parallel>], iteration_bounds = array<i64: 2>, scalar_prefetch = 0 : i64, scratch_operands = 1 : i64, tpu.core_type = #tpu.core_type<tc>, window_params = [{transform_indices = @transform_0, window_bounds = array<i64: 1, 36, 16>}, {pipeline_mode = #tpu.pipeline_mode<synchronous>, transform_indices = @transform_1, window_bounds = array<i64: 36, 1>}, {pipeline_mode = #tpu.pipeline_mode<synchronous>, transform_indices = @transform_2, window_bounds = array<i64: 16, 8>}, {pipeline_mode = #tpu.pipeline_mode<synchronous>, transform_indices = @transform_3, window_bounds = array<i64: 1, 8>}, {pipeline_mode = #tpu.pipeline_mode<synchronous>, transform_indices = @transform_4, window_bounds = array<i64: 9, 8, 8>}, {pipeline_mode = #tpu.pipeline_mode<synchronous>, transform_indices = @transform_5, window_bounds = array<i64: 1, 8>}, {pipeline_mode = #tpu.pipeline_mode<synchronous>, transform_indices = @transform_6, window_bounds = array<i64: 8, 32>}, {pipeline_mode = #tpu.pipeline_mode<synchronous>, transform_indices = @transform_7, window_bounds = array<i64: 1, 32>}, {pipeline_mode = #tpu.pipeline_mode<synchronous>, transform_indices = @transform_8, window_bounds = array<i64: 16, 32>}, {pipeline_mode = #tpu.pipeline_mode<synchronous>, transform_indices = @transform_9, window_bounds = array<i64: 1, 32>}, {transform_indices = @transform_10, window_bounds = array<i64: 1, 36, 32>}]} {
    %c0 = arith.constant 0 : index
    %c0_0 = arith.constant 0 : index
    %c0_1 = arith.constant 0 : index
    %0 = vector.load %arg1[%c0, %c0_0, %c0_1] : memref<1x36x16xf32, #tpu.memory_space<vmem>>, vector<1x36x16xf32>
    %1 = vector.shape_cast %0 : vector<1x36x16xf32> to vector<36x16xf32>
    %c0_2 = arith.constant 0 : index
    %c0_3 = arith.constant 0 : index
    %2 = vector.load %arg2[%c0_2, %c0_3] : memref<36x1xf32, #tpu.memory_space<vmem>>, vector<36x1xf32>
    %c0_4 = arith.constant 0 : index
    %c0_5 = arith.constant 0 : index
    %3 = vector.load %arg3[%c0_4, %c0_5] : memref<16x8xf32, #tpu.memory_space<vmem>>, vector<16x8xf32>
    %cst = arith.constant dense<0.000000e+00> : vector<36x8xf32>
    %4 = tpu.matmul %1, %3, %cst {dimension_numbers = #tpu.dot_dimension_numbers<[1], [0], [0], [1], [0, 0, 1, 1], [], []>} : vector<36x16xf32>, vector<16x8xf32>, vector<36x8xf32> -> vector<36x8xf32>
    %c0_6 = arith.constant 0 : index
    %c0_7 = arith.constant 0 : index
    %5 = vector.load %arg4[%c0_6, %c0_7] : memref<1x8xf32, #tpu.memory_space<vmem>>, vector<1x8xf32>
    %6 = vector.broadcast %5 : vector<1x8xf32> to vector<36x8xf32>
    %7 = arith.addf %4, %6 : vector<36x8xf32>
    %cst_8 = arith.constant 0.000000e+00 : f32
    %8 = vector.broadcast %cst_8 : f32 to vector<36x8xf32>
    %9 = arith.cmpf ogt, %7, %8 : vector<36x8xf32>
    %cst_9 = arith.constant 2.000000e-01 : f32
    %10 = vector.broadcast %cst_9 : f32 to vector<36x8xf32>
    %11 = arith.mulf %10, %7 : vector<36x8xf32>
    %12 = arith.select %9, %7, %11 : vector<36x8xi1>, vector<36x8xf32>
    %13 = vector.broadcast %2 : vector<36x1xf32> to vector<36x8xf32>
    %14 = arith.mulf %12, %13 : vector<36x8xf32>
    %cst_10 = arith.constant 0.000000e+00 : f32
    %15 = vector.broadcast %cst_10 : f32 to vector<50x8xf32>
    %c0_11 = arith.constant 0 : index
    %c0_12 = arith.constant 0 : index
    %16 = vector.load %arg12[%c0_11, %c0_12] : memref<50x8xf32, #tpu.memory_space<vmem>>, vector<50x8xf32>
    tpu.vector_store %arg12[%c0_11, %c0_12], %15 {strides = array<i32>} : memref<50x8xf32, #tpu.memory_space<vmem>>, vector<50x8xf32>,
    %c7 = arith.constant 7 : index
    %c0_13 = arith.constant 0 : index
    %17 = vector.load %arg12[%c7, %c0_13] : memref<50x8xf32, #tpu.memory_space<vmem>>, vector<36x8xf32>
    tpu.vector_store %arg12[%c7, %c0_13], %14 {strides = array<i32>} : memref<50x8xf32, #tpu.memory_space<vmem>>, vector<36x8xf32>,
    %c0_14 = arith.constant 0 : index
    %c0_15 = arith.constant 0 : index
    %18 = vector.load %arg12[%c0_14, %c0_15] : memref<50x8xf32, #tpu.memory_space<vmem>>, vector<36x8xf32>
    %c0_16 = arith.constant 0 : index
    %c0_17 = arith.constant 0 : index
    %c0_18 = arith.constant 0 : index
    %19 = vector.load %arg5[%c0_16, %c0_17, %c0_18] : memref<9x8x8xf32, #tpu.memory_space<vmem>>, vector<1x8x8xf32>
    %20 = vector.shape_cast %19 : vector<1x8x8xf32> to vector<8x8xf32>
    %cst_19 = arith.constant dense<0.000000e+00> : vector<36x8xf32>
    %21 = tpu.matmul %18, %20, %cst_19 {dimension_numbers = #tpu.dot_dimension_numbers<[1], [0], [0], [1], [0, 0, 1, 1], [], []>} : vector<36x8xf32>, vector<8x8xf32>, vector<36x8xf32> -> vector<36x8xf32>
    %c1 = arith.constant 1 : index
    %c0_20 = arith.constant 0 : index
    %22 = vector.load %arg12[%c1, %c0_20] : memref<50x8xf32, #tpu.memory_space<vmem>>, vector<36x8xf32>
    %c1_21 = arith.constant 1 : index
    %c0_22 = arith.constant 0 : index
    %c0_23 = arith.constant 0 : index
    %23 = vector.load %arg5[%c1_21, %c0_22, %c0_23] : memref<9x8x8xf32, #tpu.memory_space<vmem>>, vector<1x8x8xf32>
    %24 = vector.shape_cast %23 : vector<1x8x8xf32> to vector<8x8xf32>
    %cst_24 = arith.constant dense<0.000000e+00> : vector<36x8xf32>
    %25 = tpu.matmul %22, %24, %cst_24 {dimension_numbers = #tpu.dot_dimension_numbers<[1], [0], [0], [1], [0, 0, 1, 1], [], []>} : vector<36x8xf32>, vector<8x8xf32>, vector<36x8xf32> -> vector<36x8xf32>
    %26 = arith.addf %21, %25 : vector<36x8xf32>
    %c2 = arith.constant 2 : index
    %c0_25 = arith.constant 0 : index
    %27 = vector.load %arg12[%c2, %c0_25] : memref<50x8xf32, #tpu.memory_space<vmem>>, vector<36x8xf32>
    %c2_26 = arith.constant 2 : index
    %c0_27 = arith.constant 0 : index
    %c0_28 = arith.constant 0 : index
    %28 = vector.load %arg5[%c2_26, %c0_27, %c0_28] : memref<9x8x8xf32, #tpu.memory_space<vmem>>, vector<1x8x8xf32>
    %29 = vector.shape_cast %28 : vector<1x8x8xf32> to vector<8x8xf32>
    %cst_29 = arith.constant dense<0.000000e+00> : vector<36x8xf32>
    %30 = tpu.matmul %27, %29, %cst_29 {dimension_numbers = #tpu.dot_dimension_numbers<[1], [0], [0], [1], [0, 0, 1, 1], [], []>} : vector<36x8xf32>, vector<8x8xf32>, vector<36x8xf32> -> vector<36x8xf32>
    %31 = arith.addf %26, %30 : vector<36x8xf32>
    %c6 = arith.constant 6 : index
    %c0_30 = arith.constant 0 : index
    %32 = vector.load %arg12[%c6, %c0_30] : memref<50x8xf32, #tpu.memory_space<vmem>>, vector<36x8xf32>
    %c3 = arith.constant 3 : index
    %c0_31 = arith.constant 0 : index
    %c0_32 = arith.constant 0 : index
    %33 = vector.load %arg5[%c3, %c0_31, %c0_32] : memref<9x8x8xf32, #tpu.memory_space<vmem>>, vector<1x8x8xf32>
    %34 = vector.shape_cast %33 : vector<1x8x8xf32> to vector<8x8xf32>
    %cst_33 = arith.constant dense<0.000000e+00> : vector<36x8xf32>
    %35 = tpu.matmul %32, %34, %cst_33 {dimension_numbers = #tpu.dot_dimension_numbers<[1], [0], [0], [1], [0, 0, 1, 1], [], []>} : vector<36x8xf32>, vector<8x8xf32>, vector<36x8xf32> -> vector<36x8xf32>
    %36 = arith.addf %31, %35 : vector<36x8xf32>
    %c7_34 = arith.constant 7 : index
    %c0_35 = arith.constant 0 : index
    %37 = vector.load %arg12[%c7_34, %c0_35] : memref<50x8xf32, #tpu.memory_space<vmem>>, vector<36x8xf32>
    %c4 = arith.constant 4 : index
    %c0_36 = arith.constant 0 : index
    %c0_37 = arith.constant 0 : index
    %38 = vector.load %arg5[%c4, %c0_36, %c0_37] : memref<9x8x8xf32, #tpu.memory_space<vmem>>, vector<1x8x8xf32>
    %39 = vector.shape_cast %38 : vector<1x8x8xf32> to vector<8x8xf32>
    %cst_38 = arith.constant dense<0.000000e+00> : vector<36x8xf32>
    %40 = tpu.matmul %37, %39, %cst_38 {dimension_numbers = #tpu.dot_dimension_numbers<[1], [0], [0], [1], [0, 0, 1, 1], [], []>} : vector<36x8xf32>, vector<8x8xf32>, vector<36x8xf32> -> vector<36x8xf32>
    %41 = arith.addf %36, %40 : vector<36x8xf32>
    %c8 = arith.constant 8 : index
    %c0_39 = arith.constant 0 : index
    %42 = vector.load %arg12[%c8, %c0_39] : memref<50x8xf32, #tpu.memory_space<vmem>>, vector<36x8xf32>
    %c5 = arith.constant 5 : index
    %c0_40 = arith.constant 0 : index
    %c0_41 = arith.constant 0 : index
    %43 = vector.load %arg5[%c5, %c0_40, %c0_41] : memref<9x8x8xf32, #tpu.memory_space<vmem>>, vector<1x8x8xf32>
    %44 = vector.shape_cast %43 : vector<1x8x8xf32> to vector<8x8xf32>
    %cst_42 = arith.constant dense<0.000000e+00> : vector<36x8xf32>
    %45 = tpu.matmul %42, %44, %cst_42 {dimension_numbers = #tpu.dot_dimension_numbers<[1], [0], [0], [1], [0, 0, 1, 1], [], []>} : vector<36x8xf32>, vector<8x8xf32>, vector<36x8xf32> -> vector<36x8xf32>
    %46 = arith.addf %41, %45 : vector<36x8xf32>
    %c12 = arith.constant 12 : index
    %c0_43 = arith.constant 0 : index
    %47 = vector.load %arg12[%c12, %c0_43] : memref<50x8xf32, #tpu.memory_space<vmem>>, vector<36x8xf32>
    %c6_44 = arith.constant 6 : index
    %c0_45 = arith.constant 0 : index
    %c0_46 = arith.constant 0 : index
    %48 = vector.load %arg5[%c6_44, %c0_45, %c0_46] : memref<9x8x8xf32, #tpu.memory_space<vmem>>, vector<1x8x8xf32>
    %49 = vector.shape_cast %48 : vector<1x8x8xf32> to vector<8x8xf32>
    %cst_47 = arith.constant dense<0.000000e+00> : vector<36x8xf32>
    %50 = tpu.matmul %47, %49, %cst_47 {dimension_numbers = #tpu.dot_dimension_numbers<[1], [0], [0], [1], [0, 0, 1, 1], [], []>} : vector<36x8xf32>, vector<8x8xf32>, vector<36x8xf32> -> vector<36x8xf32>
    %51 = arith.addf %46, %50 : vector<36x8xf32>
    %c13 = arith.constant 13 : index
    %c0_48 = arith.constant 0 : index
    %52 = vector.load %arg12[%c13, %c0_48] : memref<50x8xf32, #tpu.memory_space<vmem>>, vector<36x8xf32>
    %c7_49 = arith.constant 7 : index
    %c0_50 = arith.constant 0 : index
    %c0_51 = arith.constant 0 : index
    %53 = vector.load %arg5[%c7_49, %c0_50, %c0_51] : memref<9x8x8xf32, #tpu.memory_space<vmem>>, vector<1x8x8xf32>
    %54 = vector.shape_cast %53 : vector<1x8x8xf32> to vector<8x8xf32>
    %cst_52 = arith.constant dense<0.000000e+00> : vector<36x8xf32>
    %55 = tpu.matmul %52, %54, %cst_52 {dimension_numbers = #tpu.dot_dimension_numbers<[1], [0], [0], [1], [0, 0, 1, 1], [], []>} : vector<36x8xf32>, vector<8x8xf32>, vector<36x8xf32> -> vector<36x8xf32>
    %56 = arith.addf %51, %55 : vector<36x8xf32>
    %c14 = arith.constant 14 : index
    %c0_53 = arith.constant 0 : index
    %57 = vector.load %arg12[%c14, %c0_53] : memref<50x8xf32, #tpu.memory_space<vmem>>, vector<36x8xf32>
    %c8_54 = arith.constant 8 : index
    %c0_55 = arith.constant 0 : index
    %c0_56 = arith.constant 0 : index
    %58 = vector.load %arg5[%c8_54, %c0_55, %c0_56] : memref<9x8x8xf32, #tpu.memory_space<vmem>>, vector<1x8x8xf32>
    %59 = vector.shape_cast %58 : vector<1x8x8xf32> to vector<8x8xf32>
    %cst_57 = arith.constant dense<0.000000e+00> : vector<36x8xf32>
    %60 = tpu.matmul %57, %59, %cst_57 {dimension_numbers = #tpu.dot_dimension_numbers<[1], [0], [0], [1], [0, 0, 1, 1], [], []>} : vector<36x8xf32>, vector<8x8xf32>, vector<36x8xf32> -> vector<36x8xf32>
    %61 = arith.addf %56, %60 : vector<36x8xf32>
    %c0_58 = arith.constant 0 : index
    %c0_59 = arith.constant 0 : index
    %62 = vector.load %arg6[%c0_58, %c0_59] : memref<1x8xf32, #tpu.memory_space<vmem>>, vector<1x8xf32>
    %63 = vector.broadcast %62 : vector<1x8xf32> to vector<36x8xf32>
    %64 = arith.addf %61, %63 : vector<36x8xf32>
    %cst_60 = arith.constant 0.000000e+00 : f32
    %65 = vector.broadcast %cst_60 : f32 to vector<36x8xf32>
    %66 = arith.cmpf ogt, %64, %65 : vector<36x8xf32>
    %cst_61 = arith.constant 2.000000e-01 : f32
    %67 = vector.broadcast %cst_61 : f32 to vector<36x8xf32>
    %68 = arith.mulf %67, %64 : vector<36x8xf32>
    %69 = arith.select %66, %64, %68 : vector<36x8xi1>, vector<36x8xf32>
    %c0_62 = arith.constant 0 : index
    %c0_63 = arith.constant 0 : index
    %70 = vector.load %arg7[%c0_62, %c0_63] : memref<8x32xf32, #tpu.memory_space<vmem>>, vector<8x32xf32>
    %cst_64 = arith.constant dense<0.000000e+00> : vector<36x32xf32>
    %71 = tpu.matmul %69, %70, %cst_64 {dimension_numbers = #tpu.dot_dimension_numbers<[1], [0], [0], [1], [0, 0, 1, 1], [], []>} : vector<36x8xf32>, vector<8x32xf32>, vector<36x32xf32> -> vector<36x32xf32>
    %c0_65 = arith.constant 0 : index
    %c0_66 = arith.constant 0 : index
    %72 = vector.load %arg8[%c0_65, %c0_66] : memref<1x32xf32, #tpu.memory_space<vmem>>, vector<1x32xf32>
    %73 = vector.broadcast %72 : vector<1x32xf32> to vector<36x32xf32>
    %74 = arith.addf %71, %73 : vector<36x32xf32>
    %c0_67 = arith.constant 0 : index
    %c0_68 = arith.constant 0 : index
    %75 = vector.load %arg9[%c0_67, %c0_68] : memref<16x32xf32, #tpu.memory_space<vmem>>, vector<16x32xf32>
    %cst_69 = arith.constant dense<0.000000e+00> : vector<36x32xf32>
    %76 = tpu.matmul %1, %75, %cst_69 {dimension_numbers = #tpu.dot_dimension_numbers<[1], [0], [0], [1], [0, 0, 1, 1], [], []>} : vector<36x16xf32>, vector<16x32xf32>, vector<36x32xf32> -> vector<36x32xf32>
    %c0_70 = arith.constant 0 : index
    %c0_71 = arith.constant 0 : index
    %77 = vector.load %arg10[%c0_70, %c0_71] : memref<1x32xf32, #tpu.memory_space<vmem>>, vector<1x32xf32>
    %78 = vector.broadcast %77 : vector<1x32xf32> to vector<36x32xf32>
    %79 = arith.addf %76, %78 : vector<36x32xf32>
    %80 = arith.addf %74, %79 : vector<36x32xf32>
    %cst_72 = arith.constant 0.000000e+00 : f32
    %81 = vector.broadcast %cst_72 : f32 to vector<36x32xf32>
    %82 = arith.cmpf ogt, %80, %81 : vector<36x32xf32>
    %cst_73 = arith.constant 2.000000e-01 : f32
    %83 = vector.broadcast %cst_73 : f32 to vector<36x32xf32>
    %84 = arith.mulf %83, %80 : vector<36x32xf32>
    %85 = arith.select %82, %80, %84 : vector<36x32xi1>, vector<36x32xf32>
    %86 = vector.broadcast %2 : vector<36x1xf32> to vector<36x32xf32>
    %87 = arith.mulf %85, %86 : vector<36x32xf32>
    %c0_74 = arith.constant 0 : index
    %c0_75 = arith.constant 0 : index
    %c0_76 = arith.constant 0 : index
    %88 = vector.load %arg11[%c0_74, %c0_75, %c0_76] : memref<1x36x32xf32, #tpu.memory_space<vmem>>, vector<1x36x32xf32>
    %89 = vector.shape_cast %88 : vector<1x36x32xf32> to vector<36x32xf32>
    %90 = vector.shape_cast %87 : vector<36x32xf32> to vector<1x36x32xf32>
    tpu.vector_store %arg11[%c0_74, %c0_75, %c0_76], %90 {strides = array<i32>} : memref<1x36x32xf32, #tpu.memory_space<vmem>>, vector<1x36x32xf32>,
    return
  }
  func.func @transform_0(%arg0: i32) -> (i32, i32, i32) {
    %c0_i32 = arith.constant 0 : i32
    %c0_i32_0 = arith.constant 0 : i32
    %c0_i32_1 = arith.constant 0 : i32
    return %arg0, %c0_i32, %c0_i32_0 : i32, i32, i32
  }
  func.func @transform_1(%arg0: i32) -> (i32, i32) {
    %c0_i32 = arith.constant 0 : i32
    %c0_i32_0 = arith.constant 0 : i32
    %c0_i32_1 = arith.constant 0 : i32
    return %c0_i32, %c0_i32_0 : i32, i32
  }
  func.func @transform_2(%arg0: i32) -> (i32, i32) {
    %c0_i32 = arith.constant 0 : i32
    %c0_i32_0 = arith.constant 0 : i32
    %c0_i32_1 = arith.constant 0 : i32
    return %c0_i32, %c0_i32_0 : i32, i32
  }
  func.func @transform_3(%arg0: i32) -> (i32, i32) {
    %c0_i32 = arith.constant 0 : i32
    %c0_i32_0 = arith.constant 0 : i32
    %c0_i32_1 = arith.constant 0 : i32
    return %c0_i32, %c0_i32_0 : i32, i32
  }
  func.func @transform_4(%arg0: i32) -> (i32, i32, i32) {
    %c0_i32 = arith.constant 0 : i32
    %c0_i32_0 = arith.constant 0 : i32
    %c0_i32_1 = arith.constant 0 : i32
    %c0_i32_2 = arith.constant 0 : i32
    return %c0_i32, %c0_i32_0, %c0_i32_1 : i32, i32, i32
  }
  func.func @transform_5(%arg0: i32) -> (i32, i32) {
    %c0_i32 = arith.constant 0 : i32
    %c0_i32_0 = arith.constant 0 : i32
    %c0_i32_1 = arith.constant 0 : i32
    return %c0_i32, %c0_i32_0 : i32, i32
  }
  func.func @transform_6(%arg0: i32) -> (i32, i32) {
    %c0_i32 = arith.constant 0 : i32
    %c0_i32_0 = arith.constant 0 : i32
    %c0_i32_1 = arith.constant 0 : i32
    return %c0_i32, %c0_i32_0 : i32, i32
  }
  func.func @transform_7(%arg0: i32) -> (i32, i32) {
    %c0_i32 = arith.constant 0 : i32
    %c0_i32_0 = arith.constant 0 : i32
    %c0_i32_1 = arith.constant 0 : i32
    return %c0_i32, %c0_i32_0 : i32, i32
  }
  func.func @transform_8(%arg0: i32) -> (i32, i32) {
    %c0_i32 = arith.constant 0 : i32
    %c0_i32_0 = arith.constant 0 : i32
    %c0_i32_1 = arith.constant 0 : i32
    return %c0_i32, %c0_i32_0 : i32, i32
  }
  func.func @transform_9(%arg0: i32) -> (i32, i32) {
    %c0_i32 = arith.constant 0 : i32
    %c0_i32_0 = arith.constant 0 : i32
    %c0_i32_1 = arith.constant 0 : i32
    return %c0_i32, %c0_i32_0 : i32, i32
  }
  func.func @transform_10(%arg0: i32) -> (i32, i32, i32) {
    %c0_i32 = arith.constant 0 : i32
    %c0_i32_0 = arith.constant 0 : i32
    %c0_i32_1 = arith.constant 0 : i32
    return %arg0, %c0_i32, %c0_i32_0 : i32, i32, i32
  }
}

</mosaic_0001>

<bundles_post_ra>
// kernel: tpu_custom_call.1
= control target key start
LH: loop header
LB: loop body
LE: loop exit
PB: predicated region body
PF: predicated region fallthrough
CT: control target
= control target key end

     0   :  { %s2384_s13 = smov 0   ;;  %s2761_s0 = inlined_call_operand.vmem [shape: f32[2,36,16], index: 0, kind: input, shape index: {}]   ;;  %s2762_s1 = inlined_call_operand.vmem [shape: f32[36,1], index: 1, kind: input, shape index: {}]   ;;  %s2763_s2 = inlined_call_operand.vmem [shape: f32[16,8], index: 2, kind: input, shape index: {}]   ;;  %s2764_s3 = inlined_call_operand.vmem [shape: f32[1,8], index: 3, kind: input, shape index: {}]   ;;  %s2765_s4 = inlined_call_operand.vmem [shape: f32[9,8,8], index: 4, kind: input, shape index: {}]   ;;  %s2766_s5 = inlined_call_operand.vmem [shape: f32[1,8], index: 5, kind: input, shape index: {}]   ;;  %s2767_s6 = inlined_call_operand.vmem [shape: f32[8,32], index: 6, kind: input, shape index: {}]   ;;  %s2768_s7 = inlined_call_operand.vmem [shape: f32[1,32], index: 7, kind: input, shape index: {}]   ;;  %s2769_s8 = inlined_call_operand.vmem [shape: f32[16,32], index: 8, kind: input, shape index: {}]   ;;  %s2770_s9 = inlined_call_operand.vmem [shape: f32[1,32], index: 9, kind: input, shape index: {}]   ;;  %s2771_s10 = inlined_call_operand.vmem [shape: f32[2,36,32], index: 10, kind: output, shape index: {}]  }
   0x1 LB: > { %s1913_s14 = sadd.s32 4294967295, %s2323_s13   ;;  %p1917_p0 = scmp.ge.s32.totalorder %s2323_s13, 1  ;;  %s2323_s13 = sphi %s2384_s13, %s20_s13  }
   0x2   : > { %p312_p1 = scmp.lt.s32.totalorder %s2323_s13, 3 }
   0x4   : > { %p313_p2 = pnand %p1917_p0, %p312_p1 }
   0x5   : > { %v370_v0 = vld [vmem:[%s2763_s2] sm:$0xff] (!%p313_p2)  ;;  %v371_v1 = vld [vmem:[%s2763_s2 + $0x8] sm:$0xff] (!%p313_p2)  ;;  %p350_p3 = scmp.lt.s32.totalorder (!%p313_p2), %s1913_s14, 1  ;;  %v2325_v2 = vmov (!%p313_p2), 0.0|0.0   ;;  %vm2326_vm0 = vmmov (!%p313_p2), 0   ;;  %v2327_v4 = vmov (!%p313_p2), 0.0  }
   0x6   : > { %316 = sbr.rel (%p313_p2) target bundleno = 800 (0x320), region = 60  ;;  %2276 = vmatprep.subr.bf16.mxu0 (!%p313_p2), %v2325_v2  ;;  %v2277_v3 = vpack.c.bf16 (!%p313_p2), %v371_v1, %v370_v0  ;;  %2072 = vmatprep.mubr.msk.f32.mxu0 (!%p313_p2), %vm2326_vm0, %v2327_v4  ;;  %v365_v5 = vld [vmem:[%s2762_s1] sm:$0xff] (!%p313_p2)  ;;  %v2328_v6 = vmov (!%p313_p2), 0   ;;  %v367_v7 = vld [vmem:[%s2762_s1 + $0x10] sm:$0xff] (!%p313_p2)  ;;  %v366_v8 = vld [vmem:[%s2762_s1 + $0x8] sm:$0xff] (!%p313_p2)  ;;  %vm379_vm1 = vcmask (!%p313_p2), 130048  }
   0x7   : > { %2315 = vset.pattern.permute.xlu0 (!%p313_p2), %v2328_v6  ;;  %2316 = vset.pattern.permute.xlu1 (!%p313_p2), %v2328_v6  ;;  %v368_v9 = vld [vmem:[%s2762_s1 + $0x18] sm:$0xff] (!%p313_p2)  ;;  %v1926_v10 = vld [vmem:[%s2765_s4 + $0x8] sm:$0xff] (!%p313_p2)  ;;  %v369_v12 = vld [vmem:[%s2762_s1 + $0x20] sm:$0xf] (!%p313_p2)  ;;  %vm530_vm2 = vcmask (!%p313_p2), 64512   ;;  %vm537_vm3 = vcmask (!%p313_p2), 58368  }
   0x8   : > { %2278 = vmatpush3.bf16.msra.mxu0 (!%p313_p2), %v2277_v3  ;;  %502 = vperm.xlu0 (!%p313_p2), %2315, %v365_v5   ;;  %531 = vst.msk [vmem:[#allocation2] sm:$0xff] (!%p313_p2), %vm530_vm2, %v2327_v4  ;;  %532 = vst.msk [vmem:[#allocation2 + $0x8] sm:$0xff] (!%p313_p2), %vm530_vm2, %v2327_v4  ;;  %v550_v17 = vld [vmem:[%s2765_s4] sm:$0xff] (!%p313_p2)  ;;  %v1937_v43 = vld [vmem:[%s2765_s4 + $0x10] sm:$0xff] (!%p313_p2)  ;;  %vm543_vm9 = vcmask (!%p313_p2), 60416  }
   0x9   : > { %512 = vperm.xlu1 (!%p313_p2), %2316, %v367_v7   ;;  %2087 = vmatprep.subr.mxu0 (!%p313_p2), %v2327_v4  ;;  %533 = vst.msk [vmem:[#allocation2 + $0x10] sm:$0xff] (!%p313_p2), %vm530_vm2, %v2327_v4  ;;  %534 = vst.msk [vmem:[#allocation2 + $0x18] sm:$0xff] (!%p313_p2), %vm530_vm2, %v2327_v4  ;;  %v1920_v18 = vld [vmem:[%s2764_s3] ss:$0 sm:$0xff] (!%p313_p2)  ;;  %v1943_v47 = vld [vmem:[%s2765_s4 + $0x18] sm:$0xff] (!%p313_p2) }
   0xa   : > { %2104 = vmatprep.subr.mxu1 (!%p313_p2), %v2327_v4  ;;  %2106 = vmatprep.mubr.msk.f32.mxu1 (!%p313_p2), %vm2326_vm0, %v2327_v4  ;;  %535 = vst.msk [vmem:[#allocation2 + $0x20] sm:$0xff] (!%p313_p2), %vm530_vm2, %v2327_v4  ;;  %536 = vst.msk [vmem:[#allocation2 + $0x28] sm:$0xff] (!%p313_p2), %vm530_vm2, %v2327_v4  ;;  %v1949_v3 = vld [vmem:[%s2765_s4 + $0x20] sm:$0xff] (!%p313_p2)  ;;  %v1955_v7 = vld [vmem:[%s2765_s4 + $0x28] sm:$0xff] (!%p313_p2) }
   0xb   : > { %2105 = vmatpush3.msra.mxu1 (!%p313_p2), %v550_v17  ;;  %538 = vst.msk [vmem:[#allocation2 + $0x30] sm:$0x3] (!%p313_p2), %vm537_vm3, %v2327_v4 }
   0xc   : > { %507 = vperm.xlu0 (!%p313_p2), %2315, %v366_v8   ;;  %2138 = vmatprep.subr.mxu1 (!%p313_p2), %v2327_v4 }
   0xd   : > { %s2773_s14 = smov (!%p350_p3, %s1913_s14), 1  ;;  %517 = vperm.xlu1 %2316, %v368_v9  }
   0xe   : > { %s2302_s23 = smul.u32 40, %s2773_s14 }
  0x10   : > { %s354_s30 = scalar_lea.vmem %s2761_s0, %s2302_s23  ;;  %522 = vperm.xlu0 %2315, %v369_v12   ;;  %s2742_s15 = scalar_lea.vmem %s2771_s10, %s2302_s23 }
  0x11   : > { %v2428_v11 = vld [vmem:[%s354_s30] sm:$0xff]  ;;  %v2437_v13 = vld [vmem:[%s354_s30 + $0x8] sm:$0xff]  ;;  %v2444_v14 = vld [vmem:[%s354_s30 + $0x10] sm:$0xff] }
  0x12   : > { %2073 = vmatmul.mubr.msk.f32.vlgmr.msra.gmra.mrb[0].mxu0 %vm379_vm1, %v2428_v11  ;;  %v2450_v15 = vld [vmem:[%s354_s30 + $0x18] sm:$0xff]  ;;  %v2456_v16 = vld [vmem:[%s354_s30 + $0x20] sm:$0xf] }
  0x13   : > { %2075 = vmatprep.mubr.msk.f32.mxu0 %vm2326_vm0, %v2327_v4  ;;  %2088 = vmatpush3.msra.mxu0 %v1926_v10 }
  0x14   : > { %2121 = vmatprep.subr.mxu0 %v2327_v4 }
  0x16   : > { %2076 = vmatmul.mubr.msk.f32.gmra.mrb[2].mxu0 %vm379_vm1, %v2437_v13 }
  0x17   : > { %2078 = vmatprep.mubr.msk.f32.mxu0 %vm2326_vm0, %v2327_v4 }
  0x1a   : > { %2079 = vmatmul.mubr.msk.f32.gmra.mrb[4].mxu0 %vm379_vm1, %v2444_v14 }
  0x1b   : > { %2081 = vmatprep.mubr.msk.f32.mxu0 %vm2326_vm0, %v2327_v4 }
  0x1e   : > { %2082 = vmatmul.mubr.msk.f32.gmra.mrb[6].mxu0 %vm379_vm1, %v2450_v15 }
  0x1f   : > { %2084 = vmatprep.mubr.msk.f32.mxu0 %vm2326_vm0, %v2327_v4 }
  0x22   : > { %2085 = vmatmul.mubr.msk.f32.gmra.mrb[8].mxu0 %vm379_vm1, %v2456_v16 }
  0x23   : > { %2089 = vmatprep.mubr.msk.f32.mxu0 %vm2326_vm0, %v2327_v4 }
  0x87   : > { %v2482_v22 = vpop.permute.xlu0 %502 }
  0x88   : > { %v2489_v37 = vpop.permute.xlu1 %512 }
  0x8b   : > { %v2486_v31 = vpop.permute.xlu0 %507 }
  0x8c   : > { %v2502_v49 = vpop.permute.xlu1 %517 }
  0x8f   : > { %v2517_v57 = vpop.permute.xlu0 %522 }
  0xe5   : > { %v461_v19 = vpop.f32.mrb[0].mxu0 }
  0xe6   : > { %v462_v20 = vadd.f32 %v1920_v18, %v461_v19  ;;  %v2074_v21 = vpop.f32.mrb[1].mxu0 }
  0xe7   : > { %v1961_v21 = vld [vmem:[%s2765_s4 + $0x30] sm:$0xff] }
  0xe8   : > { %vm485_vm4 = vcmp.gt.f32.partialorder %v462_v20, 0.0  ;;  %v490_v23 = vmul.f32 0.2, %v462_v20 }
  0xe9   : > { %v466_v24 = vpop.f32.mrb[2].mxu0 }
  0xea   : > { %v495_v25 = vsel %vm485_vm4, %v462_v20, %v490_v23  ;;  %v467_v26 = vadd.f32 %v1920_v18, %v466_v24  ;;  %v2077_v27 = vpop.f32.mrb[3].mxu0  ;;  %v1967_v24 = vld [vmem:[%s2765_s4 + $0x38] sm:$0xff] }
  0xeb   : > { %v525_v28 = vmul.f32 %v2482_v22, %v495_v25 }
  0xec   : > { %vm486_vm5 = vcmp.gt.f32.partialorder %v467_v26, 0.0  ;;  %v491_v29 = vmul.f32 0.2, %v467_v26 }
  0xed   : > { %539 = vst.msk [vmem:[#allocation2 + $0x7] sm:$0xff] %vm530_vm2, %v525_v28  ;;  %v471_v30 = vpop.f32.mrb[4].mxu0 }
  0xee   : > { %v496_v32 = vsel %vm486_vm5, %v467_v26, %v491_v29  ;;  %v472_v33 = vadd.f32 %v1920_v18, %v471_v30  ;;  %v2080_v34 = vpop.f32.mrb[5].mxu0  ;;  %vm1856_vm5 = vcmask 257024  }
  0xef   : > { %v526_v35 = vmul.f32 %v2486_v31, %v496_v32  ;;  %v1973_v32 = vld [vmem:[%s2765_s4 + $0x40] sm:$0xff] }
  0xf0   : > { %v492_v36 = vmul.f32 0.2, %v472_v33  ;;  %vm487_vm6 = vcmp.gt.f32.partialorder %v472_v33, 0.0 }
  0xf1   : > { %540 = vst.msk [vmem:[#allocation2 + $0xf] sm:$0xff] %vm530_vm2, %v526_v35  ;;  %v476_v38 = vpop.f32.mrb[6].mxu0 }
  0xf2   : > { %v497_v39 = vsel %vm487_vm6, %v472_v33, %v492_v36  ;;  %v477_v40 = vadd.f32 %v1920_v18, %v476_v38  ;;  %v2083_v41 = vpop.f32.mrb[7].mxu0 }
  0xf3   : > { %v527_v42 = vmul.f32 %v2489_v37, %v497_v39 }
  0xf4   : > { %v493_v44 = vmul.f32 0.2, %v477_v40  ;;  %vm488_vm7 = vcmp.gt.f32.partialorder %v477_v40, 0.0  ;;  %v551_v45 = vld [vmem:[#allocation2 + $0x1] sm:$0xff] }
  0xf5   : > { %v545_v46 = vld [vmem:[#allocation2] sm:$0xff]  ;;  %541 = vst.msk [vmem:[#allocation2 + $0x17] sm:$0xff] %vm530_vm2, %v527_v42  ;;  %v481_v48 = vpop.f32.mrb[8].mxu0  ;;  %2090 = vmatmul.mubr.msk.f32.vlgmr.msra.gmra.mrb[10].mxu0 %vm530_vm2, %v551_v45  ;;  %v1240_v42 = vld [vmem:[#allocation2 + $0x2c] sm:$0xf] }
  0xf6   : > { %2107 = vmatmul.mubr.msk.f32.vlgmr.msra.gmra.mrb[0].mxu1 %vm530_vm2, %v545_v46  ;;  %v498_v50 = vsel %vm488_vm7, %v477_v40, %v493_v44  ;;  %v482_v51 = vadd.f32 %v1920_v18, %v481_v48  ;;  %2122 = vmatpush3.msra.mxu0 %v1937_v43  ;;  %v2086_v52 = vpop.f32.mrb[9].mxu0  ;;  %v768_v5 = vld [vmem:[#allocation2 + $0x2] sm:$0xff]  ;;  %v1357_v43 = vld [vmem:[#allocation2 + $0x2d] sm:$0xf] }
  0xf7   : > { %2092 = vmatprep.mubr.msk.f32.mxu0 %vm2326_vm0, %v2327_v4  ;;  %v528_v53 = vmul.f32 %v2502_v49, %v498_v50  ;;  %2109 = vmatprep.mubr.msk.f32.mxu1 %vm2326_vm0, %v2327_v4  ;;  %v885_v6 = vld [vmem:[#allocation2 + $0x6] sm:$0xff]  ;;  %v1474_v45 = vld [vmem:[#allocation2 + $0x2e] sm:$0xf] }
  0xf8   : > { %2139 = vmatpush3.msra.mxu1 %v1943_v47  ;;  %vm489_vm8 = vcmp.gt.f32.partialorder %v482_v51, 0.0  ;;  %v494_v54 = vmul.f32 0.2, %v482_v51  ;;  %v552_v55 = vld [vmem:[#allocation2 + $0x9] sm:$0xff]  ;;  %2155 = vmatprep.subr.mxu0 %v2327_v4  ;;  %v1614_v46 = vld [vmem:[%s2767_s6] sm:$0xff] }
  0xf9   : > { %v2509_v56 = vld [vmem:[#allocation2 + $0x8] sm:$0xff]  ;;  %2172 = vmatprep.subr.mxu1 %v2327_v4  ;;  %542 = vst.msk [vmem:[#allocation2 + $0x1f] sm:$0xff] %vm530_vm2, %v528_v53  ;;  %2093 = vmatmul.mubr.msk.f32.gmra.mrb[12].mxu0 %vm530_vm2, %v552_v55 }
  0xfa   : > { %2110 = vmatmul.mubr.msk.f32.gmra.mrb[2].mxu1 %vm530_vm2, %v2509_v56  ;;  %v499_v58 = vsel %vm489_vm8, %v482_v51, %v494_v54  ;;  %2095 = vmatprep.mubr.msk.f32.mxu0 %vm2326_vm0, %v2327_v4  ;;  %v769_v8 = vld [vmem:[#allocation2 + $0xa] sm:$0xff] }
  0xfb   : > { %2112 = vmatprep.mubr.msk.f32.mxu1 %vm2326_vm0, %v2327_v4  ;;  %v529_v59 = vmul.f32 %v2517_v57, %v499_v58  ;;  %v2560_v9 = vld [vmem:[#allocation2 + $0xe] sm:$0xff] }
  0xfc   : > { %v553_v60 = vld [vmem:[#allocation2 + $0x11] sm:$0xff]  ;;  %v1002_v23 = vld [vmem:[#allocation2 + $0x7] sm:$0xff] }
  0xfd   : > { %v2524_v61 = vld [vmem:[#allocation2 + $0x10] sm:$0xff]  ;;  %544 = vst.msk [vmem:[#allocation2 + $0x27] sm:$0xf] %vm543_vm9, %v529_v59  ;;  %2096 = vmatmul.mubr.msk.f32.gmra.mrb[14].mxu0 %vm530_vm2, %v553_v60 }
  0xfe   : > { %2113 = vmatmul.mubr.msk.f32.gmra.mrb[4].mxu1 %vm530_vm2, %v2524_v61  ;;  %2098 = vmatprep.mubr.msk.f32.mxu0 %vm2326_vm0, %v2327_v4  ;;  %v770_v10 = vld [vmem:[#allocation2 + $0x12] sm:$0xff] }
  0xff   : > { %2115 = vmatprep.mubr.msk.f32.mxu1 %vm2326_vm0, %v2327_v4  ;;  %v2571_v12 = vld [vmem:[#allocation2 + $0x16] sm:$0xff]  ;;  %v1236_v33 = vld [vmem:[#allocation2 + $0xc] sm:$0xff] }
 0x100   : > { %v554_v62 = vld [vmem:[#allocation2 + $0x19] sm:$0xff]  ;;  %v555_v0 = vld [vmem:[#allocation2 + $0x21] sm:$0xf]  ;;  %v1003_v25 = vld [vmem:[#allocation2 + $0xf] sm:$0xff] }
 0x101   : > { %v2533_v63 = vld [vmem:[#allocation2 + $0x18] sm:$0xff]  ;;  %2099 = vmatmul.mubr.msk.f32.gmra.mrb[16].mxu0 %vm530_vm2, %v554_v62  ;;  %v549_v1 = vld [vmem:[#allocation2 + $0x20] sm:$0xf]  ;;  %v1353_v34 = vld [vmem:[#allocation2 + $0xd] sm:$0xff] }
 0x102   : > { %2116 = vmatmul.mubr.msk.f32.gmra.mrb[6].mxu1 %vm530_vm2, %v2533_v63  ;;  %2101 = vmatprep.mubr.msk.f32.mxu0 %vm2326_vm0, %v2327_v4  ;;  %v771_v17 = vld [vmem:[#allocation2 + $0x1a] sm:$0xff]  ;;  %v772_v19 = vld [vmem:[#allocation2 + $0x22] sm:$0xf] }
 0x103   : > { %2118 = vmatprep.mubr.msk.f32.mxu1 %vm2326_vm0, %v2327_v4  ;;  %v2580_v18 = vld [vmem:[#allocation2 + $0x1e] sm:$0xff]  ;;  %v1237_v35 = vld [vmem:[#allocation2 + $0x14] sm:$0xff] }
 0x104   : > { %v889_v20 = vld [vmem:[#allocation2 + $0x26] sm:$0xf]  ;;  %v1004_v26 = vld [vmem:[#allocation2 + $0x17] sm:$0xff] }
 0x105   : > { %2102 = vmatmul.mubr.msk.f32.gmra.mrb[18].mxu0 %vm530_vm2, %v555_v0  ;;  %v1005_v27 = vld [vmem:[#allocation2 + $0x1f] sm:$0xff]  ;;  %v1006_v29 = vld [vmem:[#allocation2 + $0x27] sm:$0xf]  ;;  %v1354_v36 = vld [vmem:[#allocation2 + $0x15] sm:$0xff] }
 0x106   : > { %2119 = vmatmul.mubr.msk.f32.gmra.mrb[8].mxu1 %vm530_vm2, %v549_v1  ;;  %2123 = vmatprep.mubr.msk.f32.mxu0 %vm2326_vm0, %v2327_v4  ;;  %v1122_v28 = vld [vmem:[#allocation2 + $0x20] sm:$0xff]  ;;  %v1123_v30 = vld [vmem:[#allocation2 + $0x28] sm:$0xf] }
 0x107   : > { %2140 = vmatprep.mubr.msk.f32.mxu1 %vm2326_vm0, %v2327_v4  ;;  %v1238_v38 = vld [vmem:[#allocation2 + $0x1c] sm:$0xff]  ;;  %v1239_v40 = vld [vmem:[#allocation2 + $0x24] sm:$0xff] }
 0x108   : > { %v1355_v39 = vld [vmem:[#allocation2 + $0x1d] sm:$0xff]  ;;  %v1356_v41 = vld [vmem:[#allocation2 + $0x25] sm:$0xff] }
 0x109   : > { %2124 = vmatmul.mubr.msk.f32.vlgmr.msra.gmra.mrb[20].mxu0 %vm530_vm2, %v768_v5  ;;  %v1473_v44 = vld [vmem:[#allocation2 + $0x26] sm:$0xff] }
 0x10a   : > { %2141 = vmatmul.mubr.msk.f32.vlgmr.msra.gmra.mrb[10].mxu1 %vm530_vm2, %v885_v6  ;;  %2156 = vmatpush3.msra.mxu0 %v1949_v3 }
 0x10b   : > { %2126 = vmatprep.mubr.msk.f32.mxu0 %vm2326_vm0, %v2327_v4  ;;  %2143 = vmatprep.mubr.msk.f32.mxu1 %vm2326_vm0, %v2327_v4 }
 0x10c   : > { %2173 = vmatpush3.msra.mxu1 %v1955_v7  ;;  %2189 = vmatprep.subr.mxu0 %v2327_v4 }
 0x10d   : > { %2206 = vmatprep.subr.mxu1 %v2327_v4  ;;  %2127 = vmatmul.mubr.msk.f32.gmra.mrb[22].mxu0 %vm530_vm2, %v769_v8 }
 0x10e   : > { %2144 = vmatmul.mubr.msk.f32.gmra.mrb[12].mxu1 %vm530_vm2, %v2560_v9  ;;  %2129 = vmatprep.mubr.msk.f32.mxu0 %vm2326_vm0, %v2327_v4 }
 0x10f   : > { %2146 = vmatprep.mubr.msk.f32.mxu1 %vm2326_vm0, %v2327_v4 }
 0x111   : > { %2130 = vmatmul.mubr.msk.f32.gmra.mrb[24].mxu0 %vm530_vm2, %v770_v10 }
 0x112   : > { %2147 = vmatmul.mubr.msk.f32.gmra.mrb[14].mxu1 %vm530_vm2, %v2571_v12  ;;  %2132 = vmatprep.mubr.msk.f32.mxu0 %vm2326_vm0, %v2327_v4 }
 0x113   : > { %2149 = vmatprep.mubr.msk.f32.mxu1 %vm2326_vm0, %v2327_v4 }
 0x115   : > { %2133 = vmatmul.mubr.msk.f32.gmra.mrb[26].mxu0 %vm530_vm2, %v771_v17 }
 0x116   : > { %2150 = vmatmul.mubr.msk.f32.gmra.mrb[16].mxu1 %vm530_vm2, %v2580_v18  ;;  %2135 = vmatprep.mubr.msk.f32.mxu0 %vm2326_vm0, %v2327_v4 }
 0x117   : > { %2152 = vmatprep.mubr.msk.f32.mxu1 %vm2326_vm0, %v2327_v4 }
 0x119   : > { %2136 = vmatmul.mubr.msk.f32.gmra.mrb[28].mxu0 %vm530_vm2, %v772_v19 }
 0x11a   : > { %2153 = vmatmul.mubr.msk.f32.gmra.mrb[18].mxu1 %vm530_vm2, %v889_v20  ;;  %2157 = vmatprep.mubr.msk.f32.mxu0 %vm2326_vm0, %v2327_v4 }
 0x11b   : > { %2174 = vmatprep.mubr.msk.f32.mxu1 %vm2326_vm0, %v2327_v4 }
 0x11d   : > { %2158 = vmatmul.mubr.msk.f32.vlgmr.msra.gmra.mrb[30].mxu0 %vm530_vm2, %v1002_v23 }
 0x11e   : > { %2175 = vmatmul.mubr.msk.f32.vlgmr.msra.gmra.mrb[20].mxu1 %vm530_vm2, %v2509_v56  ;;  %2190 = vmatpush3.msra.mxu0 %v1961_v21 }
 0x11f   : > { %2160 = vmatprep.mubr.msk.f32.mxu0 %vm2326_vm0, %v2327_v4  ;;  %2177 = vmatprep.mubr.msk.f32.mxu1 %vm2326_vm0, %v2327_v4 }
 0x120   : > { %2207 = vmatpush3.msra.mxu1 %v1967_v24  ;;  %2223 = vmatprep.subr.mxu0 %v2327_v4 }
 0x121   : > { %2240 = vmatprep.subr.mxu1 %v2327_v4  ;;  %2161 = vmatmul.mubr.msk.f32.gmra.mrb[32].mxu0 %vm530_vm2, %v1003_v25 }
 0x122   : > { %2178 = vmatmul.mubr.msk.f32.gmra.mrb[22].mxu1 %vm530_vm2, %v2524_v61  ;;  %2163 = vmatprep.mubr.msk.f32.mxu0 %vm2326_vm0, %v2327_v4 }
 0x123   : > { %2180 = vmatprep.mubr.msk.f32.mxu1 %vm2326_vm0, %v2327_v4 }
 0x125   : > { %2164 = vmatmul.mubr.msk.f32.gmra.mrb[34].mxu0 %vm530_vm2, %v1004_v26 }
 0x126   : > { %2181 = vmatmul.mubr.msk.f32.gmra.mrb[24].mxu1 %vm530_vm2, %v2533_v63  ;;  %2166 = vmatprep.mubr.msk.f32.mxu0 %vm2326_vm0, %v2327_v4 }
 0x127   : > { %2183 = vmatprep.mubr.msk.f32.mxu1 %vm2326_vm0, %v2327_v4 }
 0x129   : > { %2167 = vmatmul.mubr.msk.f32.gmra.mrb[36].mxu0 %vm530_vm2, %v1005_v27 }
 0x12a   : > { %2184 = vmatmul.mubr.msk.f32.gmra.mrb[26].mxu1 %vm530_vm2, %v1122_v28  ;;  %2169 = vmatprep.mubr.msk.f32.mxu0 %vm2326_vm0, %v2327_v4 }
 0x12b   : > { %2186 = vmatprep.mubr.msk.f32.mxu1 %vm2326_vm0, %v2327_v4 }
 0x12d   : > { %2170 = vmatmul.mubr.msk.f32.gmra.mrb[38].mxu0 %vm530_vm2, %v1006_v29 }
 0x12e   : > { %2187 = vmatmul.mubr.msk.f32.gmra.mrb[28].mxu1 %vm530_vm2, %v1123_v30  ;;  %2191 = vmatprep.mubr.msk.f32.mxu0 %vm2326_vm0, %v2327_v4 }
 0x12f   : > { %2208 = vmatprep.mubr.msk.f32.mxu1 %vm2326_vm0, %v2327_v4 }
 0x131   : > { %2192 = vmatmul.mubr.msk.f32.vlgmr.msra.gmra.mrb[40].mxu0 %vm530_vm2, %v1236_v33 }
 0x132   : > { %2209 = vmatmul.mubr.msk.f32.vlgmr.msra.gmra.mrb[30].mxu1 %vm530_vm2, %v1353_v34  ;;  %2224 = vmatpush3.msra.mxu0 %v1973_v32 }
 0x133   : > { %2194 = vmatprep.mubr.msk.f32.mxu0 %vm2326_vm0, %v2327_v4  ;;  %2211 = vmatprep.mubr.msk.f32.mxu1 %vm2326_vm0, %v2327_v4 }
 0x134   : > { %2241 = vmatpush3.msra.mxu1 %v1614_v46 }
 0x135   : > { %2195 = vmatmul.mubr.msk.f32.gmra.mrb[42].mxu0 %vm530_vm2, %v1237_v35  ;;  %2279 = vmatprep.subr.bf16.mxu1 %v2325_v2 }
 0x136   : > { %2212 = vmatmul.mubr.msk.f32.gmra.mrb[32].mxu1 %vm530_vm2, %v1354_v36  ;;  %2197 = vmatprep.mubr.msk.f32.mxu0 %vm2326_vm0, %v2327_v4 }
 0x137   : > { %2214 = vmatprep.mubr.msk.f32.mxu1 %vm2326_vm0, %v2327_v4 }
 0x139   : > { %2198 = vmatmul.mubr.msk.f32.gmra.mrb[44].mxu0 %vm530_vm2, %v1238_v38 }
 0x13a   : > { %2215 = vmatmul.mubr.msk.f32.gmra.mrb[34].mxu1 %vm530_vm2, %v1355_v39  ;;  %2200 = vmatprep.mubr.msk.f32.mxu0 %vm2326_vm0, %v2327_v4 }
 0x13b   : > { %2217 = vmatprep.mubr.msk.f32.mxu1 %vm2326_vm0, %v2327_v4 }
 0x13d   : > { %2201 = vmatmul.mubr.msk.f32.gmra.mrb[46].mxu0 %vm530_vm2, %v1239_v40 }
 0x13e   : > { %2218 = vmatmul.mubr.msk.f32.gmra.mrb[36].mxu1 %vm530_vm2, %v1356_v41  ;;  %2203 = vmatprep.mubr.msk.f32.mxu0 %vm2326_vm0, %v2327_v4 }
 0x13f   : > { %2220 = vmatprep.mubr.msk.f32.mxu1 %vm2326_vm0, %v2327_v4 }
 0x141   : > { %2204 = vmatmul.mubr.msk.f32.gmra.mrb[48].mxu0 %vm530_vm2, %v1240_v42 }
 0x142   : > { %2221 = vmatmul.mubr.msk.f32.gmra.mrb[38].mxu1 %vm530_vm2, %v1357_v43  ;;  %2225 = vmatprep.mubr.msk.f32.mxu0 %vm2326_vm0, %v2327_v4 }
 0x143   : > { %2242 = vmatprep.mubr.msk.f32.mxu1 %vm2326_vm0, %v2327_v4 }
 0x145   : > { %2226 = vmatmul.mubr.msk.f32.vlgmr.msra.gmra.mrb[50].mxu0 %vm530_vm2, %v2560_v9 }
 0x146   : > { %2228 = vmatprep.mubr.msk.f32.mxu0 %vm2326_vm0, %v2327_v4 }
 0x149   : > { %2229 = vmatmul.mubr.msk.f32.gmra.mrb[52].mxu0 %vm530_vm2, %v2571_v12 }
 0x14a   : > { %2231 = vmatprep.mubr.msk.f32.mxu0 %vm2326_vm0, %v2327_v4 }
 0x14d   : > { %2232 = vmatmul.mubr.msk.f32.gmra.mrb[54].mxu0 %vm530_vm2, %v2580_v18 }
 0x14e   : > { %2234 = vmatprep.mubr.msk.f32.mxu0 %vm2326_vm0, %v2327_v4 }
 0x151   : > { %2235 = vmatmul.mubr.msk.f32.gmra.mrb[56].mxu0 %vm530_vm2, %v1473_v44 }
 0x152   : > { %2237 = vmatprep.mubr.msk.f32.mxu0 %vm2326_vm0, %v2327_v4 }
 0x155   : > { %2238 = vmatmul.mubr.msk.f32.gmra.mrb[58].mxu0 %vm530_vm2, %v1474_v45 }
 0x1c8   : > { %v639_v47 = vpop.f32.mrb[10].mxu0 }
 0x1c9   : > { %v744_v48 = vpop.f32.mrb[0].mxu1  ;;  %v2091_v51 = vpop.f32.mrb[11].mxu0 }
 0x1ca   : > { %v745_v50 = vadd.f32 %v744_v48, %v639_v47  ;;  %v2108_v52 = vpop.f32.mrb[1].mxu1 }
 0x1cc   : > { %v644_v53 = vpop.f32.mrb[12].mxu0 }
 0x1cd   : > { %v749_v54 = vpop.f32.mrb[2].mxu1  ;;  %v2094_v56 = vpop.f32.mrb[13].mxu0 }
 0x1ce   : > { %v750_v55 = vadd.f32 %v749_v54, %v644_v53  ;;  %v2111_v58 = vpop.f32.mrb[3].mxu1 }
 0x1d0   : > { %v649_v59 = vpop.f32.mrb[14].mxu0 }
 0x1d1   : > { %v754_v60 = vpop.f32.mrb[4].mxu1  ;;  %v2097_v62 = vpop.f32.mrb[15].mxu0 }
 0x1d2   : > { %v755_v61 = vadd.f32 %v754_v60, %v649_v59  ;;  %v2114_v63 = vpop.f32.mrb[5].mxu1 }
 0x1d4   : > { %v654_v0 = vpop.f32.mrb[16].mxu0 }
 0x1d5   : > { %v759_v1 = vpop.f32.mrb[6].mxu1  ;;  %v2100_v5 = vpop.f32.mrb[17].mxu0 }
 0x1d6   : > { %v760_v3 = vadd.f32 %v759_v1, %v654_v0  ;;  %v2117_v2 = vpop.f32.mrb[7].mxu1 }
 0x1d8   : > { %v659_v6 = vpop.f32.mrb[18].mxu0 }
 0x1d9   : > { %v764_v7 = vpop.f32.mrb[8].mxu1  ;;  %v2103_v9 = vpop.f32.mrb[19].mxu0 }
 0x1da   : > { %v765_v8 = vadd.f32 %v764_v7, %v659_v6  ;;  %v2120_v10 = vpop.f32.mrb[9].mxu1 }
 0x1dc   : > { %v856_v12 = vpop.f32.mrb[20].mxu0 }
 0x1dd   : > { %v973_v17 = vpop.f32.mrb[10].mxu1  ;;  %v880_v18 = vadd.f32 %v856_v12, %v745_v50  ;;  %v2125_v19 = vpop.f32.mrb[21].mxu0 }
 0x1de   : > { %v2142_v20 = vpop.f32.mrb[11].mxu1 }
 0x1df   : > { %v997_v21 = vadd.f32 %v973_v17, %v880_v18 }
 0x1e0   : > { %v861_v23 = vpop.f32.mrb[22].mxu0 }
 0x1e1   : > { %v978_v24 = vpop.f32.mrb[12].mxu1  ;;  %v881_v25 = vadd.f32 %v861_v23, %v750_v55  ;;  %v2128_v26 = vpop.f32.mrb[23].mxu0 }
 0x1e2   : > { %v2145_v27 = vpop.f32.mrb[13].mxu1 }
 0x1e3   : > { %v998_v28 = vadd.f32 %v978_v24, %v881_v25 }
 0x1e4   : > { %v866_v29 = vpop.f32.mrb[24].mxu0 }
 0x1e5   : > { %v983_v30 = vpop.f32.mrb[14].mxu1  ;;  %v882_v32 = vadd.f32 %v866_v29, %v755_v61  ;;  %v2131_v33 = vpop.f32.mrb[25].mxu0 }
 0x1e6   : > { %v2148_v34 = vpop.f32.mrb[15].mxu1 }
 0x1e7   : > { %v999_v35 = vadd.f32 %v983_v30, %v882_v32 }
 0x1e8   : > { %v871_v36 = vpop.f32.mrb[26].mxu0 }
 0x1e9   : > { %v988_v38 = vpop.f32.mrb[16].mxu1  ;;  %v883_v39 = vadd.f32 %v871_v36, %v760_v3  ;;  %v2134_v40 = vpop.f32.mrb[27].mxu0 }
 0x1ea   : > { %v2151_v41 = vpop.f32.mrb[17].mxu1 }
 0x1eb   : > { %v1000_v42 = vadd.f32 %v988_v38, %v883_v39 }
 0x1ec   : > { %v876_v43 = vpop.f32.mrb[28].mxu0 }
 0x1ed   : > { %v993_v44 = vpop.f32.mrb[18].mxu1  ;;  %v884_v45 = vadd.f32 %v876_v43, %v765_v8  ;;  %v2137_v46 = vpop.f32.mrb[29].mxu0 }
 0x1ee   : > { %v2154_v47 = vpop.f32.mrb[19].mxu1 }
 0x1ef   : > { %v1001_v48 = vadd.f32 %v993_v44, %v884_v45 }
 0x1f0   : > { %v1090_v50 = vpop.f32.mrb[30].mxu0 }
 0x1f1   : > { %v1207_v51 = vpop.f32.mrb[20].mxu1  ;;  %v1114_v52 = vadd.f32 %v1090_v50, %v997_v21  ;;  %v2159_v53 = vpop.f32.mrb[31].mxu0 }
 0x1f2   : > { %v2176_v54 = vpop.f32.mrb[21].mxu1 }
 0x1f3   : > { %v1231_v55 = vadd.f32 %v1207_v51, %v1114_v52 }
 0x1f4   : > { %v1095_v56 = vpop.f32.mrb[32].mxu0 }
 0x1f5   : > { %v1212_v58 = vpop.f32.mrb[22].mxu1  ;;  %v1115_v59 = vadd.f32 %v1095_v56, %v998_v28  ;;  %v2162_v60 = vpop.f32.mrb[33].mxu0 }
 0x1f6   : > { %v2179_v61 = vpop.f32.mrb[23].mxu1 }
 0x1f7   : > { %v1232_v62 = vadd.f32 %v1212_v58, %v1115_v59  ;;  %v1979_v59 = vld [vmem:[%s2766_s5] ss:$0 sm:$0xff] }
 0x1f8   : > { %v1100_v63 = vpop.f32.mrb[34].mxu0 }
 0x1f9   : > { %v1217_v0 = vpop.f32.mrb[24].mxu1  ;;  %v1116_v1 = vadd.f32 %v1100_v63, %v999_v35  ;;  %v2165_v3 = vpop.f32.mrb[35].mxu0  ;;  %v1728_v63 = vld [vmem:[%s2769_s8 + $0x8] sm:$0xff] }
 0x1fa   : > { %v2182_v5 = vpop.f32.mrb[25].mxu1 }
 0x1fb   : > { %v1233_v2 = vadd.f32 %v1217_v0, %v1116_v1 }
 0x1fc   : > { %v1105_v6 = vpop.f32.mrb[36].mxu0 }
 0x1fd   : > { %v1222_v7 = vpop.f32.mrb[26].mxu1  ;;  %v1117_v8 = vadd.f32 %v1105_v6, %v1000_v42  ;;  %v2168_v9 = vpop.f32.mrb[37].mxu0 }
 0x1fe   : > { %v2185_v10 = vpop.f32.mrb[27].mxu1 }
 0x1ff   : > { %v1234_v12 = vadd.f32 %v1222_v7, %v1117_v8 }
 0x200   : > { %v1110_v17 = vpop.f32.mrb[38].mxu0 }
 0x201   : > { %v1227_v18 = vpop.f32.mrb[28].mxu1  ;;  %v1118_v19 = vadd.f32 %v1110_v17, %v1001_v48  ;;  %v2171_v20 = vpop.f32.mrb[39].mxu0 }
 0x202   : > { %v2188_v21 = vpop.f32.mrb[29].mxu1 }
 0x203   : > { %v1235_v23 = vadd.f32 %v1227_v18, %v1118_v19 }
 0x204   : > { %v1324_v24 = vpop.f32.mrb[40].mxu0 }
 0x205   : > { %v1441_v25 = vpop.f32.mrb[30].mxu1  ;;  %v1348_v26 = vadd.f32 %v1324_v24, %v1231_v55  ;;  %v2193_v27 = vpop.f32.mrb[41].mxu0 }
 0x206   : > { %v2210_v28 = vpop.f32.mrb[31].mxu1 }
 0x207   : > { %v1465_v29 = vadd.f32 %v1441_v25, %v1348_v26 }
 0x208   : > { %v1329_v30 = vpop.f32.mrb[42].mxu0 }
 0x209   : > { %v1446_v32 = vpop.f32.mrb[32].mxu1  ;;  %v1349_v33 = vadd.f32 %v1329_v30, %v1232_v62  ;;  %v2196_v34 = vpop.f32.mrb[43].mxu0  ;;  %v1727_v62 = vld [vmem:[%s2769_s8] sm:$0xff] }
 0x20a   : > { %v2213_v35 = vpop.f32.mrb[33].mxu1  ;;  %v2280_v6 = vpack.c.bf16 %v1728_v63, %v1727_v62 }
 0x20b   : > { %v1466_v36 = vadd.f32 %v1446_v32, %v1349_v33 }
 0x20c   : > { %v1334_v38 = vpop.f32.mrb[44].mxu0 }
 0x20d   : > { %v1451_v39 = vpop.f32.mrb[34].mxu1  ;;  %v1350_v40 = vadd.f32 %v1334_v38, %v1233_v2  ;;  %v2199_v41 = vpop.f32.mrb[45].mxu0 }
 0x20e   : > { %v2216_v42 = vpop.f32.mrb[35].mxu1 }
 0x20f   : > { %v1467_v43 = vadd.f32 %v1451_v39, %v1350_v40 }
 0x210   : > { %v1339_v44 = vpop.f32.mrb[46].mxu0 }
 0x211   : > { %v1456_v45 = vpop.f32.mrb[36].mxu1  ;;  %v1351_v46 = vadd.f32 %v1339_v44, %v1234_v12  ;;  %v2202_v47 = vpop.f32.mrb[47].mxu0 }
 0x212   : > { %v2219_v48 = vpop.f32.mrb[37].mxu1 }
 0x213   : > { %v1468_v50 = vadd.f32 %v1456_v45, %v1351_v46 }
 0x214   : > { %v1344_v51 = vpop.f32.mrb[48].mxu0 }
 0x215   : > { %v1461_v52 = vpop.f32.mrb[38].mxu1  ;;  %v1352_v53 = vadd.f32 %v1344_v51, %v1235_v23  ;;  %v2205_v54 = vpop.f32.mrb[49].mxu0 }
 0x216   : > { %v2222_v55 = vpop.f32.mrb[39].mxu1 }
 0x217   : > { %v1469_v56 = vadd.f32 %v1461_v52, %v1352_v53 }
 0x218   : > { %v1558_v58 = vpop.f32.mrb[50].mxu0 }
 0x219   : > { %v1582_v60 = vadd.f32 %v1558_v58, %v1465_v29  ;;  %v2227_v61 = vpop.f32.mrb[51].mxu0 }
 0x21b   : > { %v1594_v0 = vadd.f32 %v1979_v59, %v1582_v60 }
 0x21c   : > { %v1563_v1 = vpop.f32.mrb[52].mxu0 }
 0x21d   : > { %vm1599_vm10 = vcmp.gt.f32.partialorder %v1594_v0, 0.0  ;;  %v1604_v3 = vmul.f32 0.2, %v1594_v0  ;;  %v1583_v5 = vadd.f32 %v1563_v1, %v1466_v36  ;;  %v2230_v2 = vpop.f32.mrb[53].mxu0 }
 0x21f   : > { %v1609_v7 = vsel %vm1599_vm10, %v1594_v0, %v1604_v3  ;;  %v1595_v8 = vadd.f32 %v1979_v59, %v1583_v5 }
 0x220   : > { %v1568_v9 = vpop.f32.mrb[54].mxu0  ;;  %2243 = vmatmul.mubr.msk.f32.vlgmr.msra.gmra.mrb[40].mxu1 %vm530_vm2, %v1609_v7 }
 0x221   : > { %v1605_v10 = vmul.f32 0.2, %v1595_v8  ;;  %v1584_v12 = vadd.f32 %v1568_v9, %v1467_v43  ;;  %2281 = vmatpush3.bf16.msra.mxu1 %v2280_v6  ;;  %v2233_v17 = vpop.f32.mrb[55].mxu0  ;;  %2245 = vmatprep.mubr.msk.f32.mxu1 %vm2326_vm0, %v2327_v4  ;;  %vm1600_vm11 = vcmp.gt.f32.partialorder %v1595_v8, 0.0 }
 0x223   : > { %v1596_v18 = vadd.f32 %v1979_v59, %v1584_v12  ;;  %v1610_v19 = vsel %vm1600_vm11, %v1595_v8, %v1605_v10 }
 0x224   : > { %v1573_v20 = vpop.f32.mrb[56].mxu0  ;;  %2246 = vmatmul.mubr.msk.f32.gmra.mrb[42].mxu1 %vm530_vm2, %v1610_v19 }
 0x225   : > { %v1606_v21 = vmul.f32 0.2, %v1596_v18  ;;  %v1585_v23 = vadd.f32 %v1573_v20, %v1468_v50  ;;  %v2236_v24 = vpop.f32.mrb[57].mxu0  ;;  %2248 = vmatprep.mubr.msk.f32.mxu1 %vm2326_vm0, %v2327_v4  ;;  %vm1601_vm12 = vcmp.gt.f32.partialorder %v1596_v18, 0.0 }
 0x227   : > { %v1597_v25 = vadd.f32 %v1979_v59, %v1585_v23  ;;  %v1611_v26 = vsel %vm1601_vm12, %v1596_v18, %v1606_v21 }
 0x228   : > { %v1578_v27 = vpop.f32.mrb[58].mxu0  ;;  %2249 = vmatmul.mubr.msk.f32.gmra.mrb[44].mxu1 %vm530_vm2, %v1611_v26 }
 0x229   : > { %v1607_v28 = vmul.f32 0.2, %v1597_v25  ;;  %v1586_v29 = vadd.f32 %v1578_v27, %v1469_v56  ;;  %v2239_v30 = vpop.f32.mrb[59].mxu0  ;;  %2251 = vmatprep.mubr.msk.f32.mxu1 %vm2326_vm0, %v2327_v4  ;;  %vm1602_vm13 = vcmp.gt.f32.partialorder %v1597_v25, 0.0 }
 0x22b   : > { %v1598_v32 = vadd.f32 %v1979_v59, %v1586_v29  ;;  %v1612_v33 = vsel %vm1602_vm13, %v1597_v25, %v1607_v28 }
 0x22c   : > { %2252 = vmatmul.mubr.msk.f32.gmra.mrb[46].mxu1 %vm530_vm2, %v1612_v33 }
 0x22d   : > { %v1608_v34 = vmul.f32 0.2, %v1598_v32  ;;  %2254 = vmatprep.mubr.msk.f32.mxu1 %vm2326_vm0, %v2327_v4  ;;  %vm1603_vm14 = vcmp.gt.f32.partialorder %v1598_v32, 0.0 }
 0x22f   : > { %v1613_v35 = vsel %vm1603_vm14, %v1598_v32, %v1608_v34 }
 0x230   : > { %2255 = vmatmul.mubr.msk.f32.gmra.mrb[48].mxu1 %vm530_vm2, %v1613_v35 }
 0x231   : > { %2261 = vmatprep.mubr.msk.f32.mxu1 %vm2326_vm0, %v2327_v4 }
 0x234   : > { %2262 = vmatmul.mubr.msk.f32.vlgmr.msra.gmra.mrb[40].mxu1 %vm379_vm1, %v2428_v11  ;;  %v1980_v11 = vld [vmem:[%s2768_s7] ss:$0 sm:$0xff] }
 0x235   : > { %2264 = vmatprep.mubr.msk.f32.mxu1 %vm2326_vm0, %v2327_v4 }
 0x238   : > { %2265 = vmatmul.mubr.msk.f32.gmra.mrb[42].mxu1 %vm379_vm1, %v2437_v13  ;;  %v1986_v13 = vld [vmem:[%s2770_s9] ss:$0 sm:$0xff] }
 0x239   : > { %2267 = vmatprep.mubr.msk.f32.mxu1 %vm2326_vm0, %v2327_v4 }
 0x23c   : > { %2268 = vmatmul.mubr.msk.f32.gmra.mrb[44].mxu1 %vm379_vm1, %v2444_v14  ;;  %v2282_v14 = vadd.f32 %v1986_v13, %v1980_v11 }
 0x23d   : > { %2270 = vmatprep.mubr.msk.f32.mxu1 %vm2326_vm0, %v2327_v4 }
 0x240   : > { %2271 = vmatmul.mubr.msk.f32.gmra.mrb[46].mxu1 %vm379_vm1, %v2450_v15 }
 0x241   : > { %2273 = vmatprep.mubr.msk.f32.mxu1 %vm2326_vm0, %v2327_v4  ;;  %vm1851_vm0 = vcmask 261120  }
 0x244   : > { %2274 = vmatmul.mubr.msk.f32.gmra.mrb[48].mxu1 %vm379_vm1, %v2456_v16 }
 0x307   : > { %v1802_v36 = vpop.f32.mrb[40].mxu1 }
 0x308   : > { %v2283_v38 = vadd.f32 %v2282_v14, %v1802_v36  ;;  %v2263_v39 = vpop.f32.mrb[41].mxu1 }
 0x30a   : > { %vm1831_vm15 = vcmp.gt.f32.partialorder %v2283_v38, 0.0  ;;  %v1836_v15 = vmul.f32 0.2, %v2283_v38 }
 0x30b   : > { %v1807_v40 = vpop.f32.mrb[42].mxu1 }
 0x30c   : > { %v1841_v4 = vsel %vm1831_vm15, %v2283_v38, %v1836_v15  ;;  %v2285_v16 = vadd.f32 %v2282_v14, %v1807_v40  ;;  %v2266_v41 = vpop.f32.mrb[43].mxu1 }
 0x30d   : > { %v1846_v42 = vmul.f32 %v1841_v4, %v2482_v22 }
 0x30e   : > { %vm1832_vm1 = vcmp.gt.f32.partialorder %v2285_v16, 0.0  ;;  %v1837_v43 = vmul.f32 0.2, %v2285_v16 }
 0x30f   : > { %1852 = vst.msk [vmem:[%s2742_s15] sm:$0xff] %vm1851_vm0, %v1846_v42  ;;  %v1812_v44 = vpop.f32.mrb[44].mxu1 }
 0x310   : > { %v1842_v45 = vsel %vm1832_vm1, %v2285_v16, %v1837_v43  ;;  %v2287_v46 = vadd.f32 %v2282_v14, %v1812_v44  ;;  %v2269_v47 = vpop.f32.mrb[45].mxu1 }
 0x311   : > { %v1847_v48 = vmul.f32 %v1842_v45, %v2486_v31 }
 0x312   : > { %vm1833_vm2 = vcmp.gt.f32.partialorder %v2287_v46, 0.0  ;;  %v1838_v50 = vmul.f32 0.2, %v2287_v46 }
 0x313   : > { %1853 = vst.msk [vmem:[%s2742_s15 + $0x8] sm:$0xff] %vm1851_vm0, %v1847_v48  ;;  %v1817_v51 = vpop.f32.mrb[46].mxu1 }
 0x314   : > { %v1843_v52 = vsel %vm1833_vm2, %v2287_v46, %v1838_v50  ;;  %v2289_v53 = vadd.f32 %v2282_v14, %v1817_v51  ;;  %v2272_v22 = vpop.f32.mrb[47].mxu1 }
 0x315   : > { %v1848_v54 = vmul.f32 %v1843_v52, %v2489_v37 }
 0x316   : > { %vm1834_vm3 = vcmp.gt.f32.partialorder %v2289_v53, 0.0  ;;  %v1839_v55 = vmul.f32 0.2, %v2289_v53 }
 0x317   : > { %1854 = vst.msk [vmem:[%s2742_s15 + $0x10] sm:$0xff] %vm1851_vm0, %v1848_v54  ;;  %v1822_v56 = vpop.f32.mrb[48].mxu1 }
 0x318   : > { %v1844_v58 = vsel %vm1834_vm3, %v2289_v53, %v1839_v55  ;;  %v2291_v59 = vadd.f32 %v2282_v14, %v1822_v56  ;;  %v2275_v31 = vpop.f32.mrb[49].mxu1 }
 0x319   : > { %v1849_v60 = vmul.f32 %v1844_v58, %v2502_v49 }
 0x31a   : > { %vm1835_vm4 = vcmp.gt.f32.partialorder %v2291_v59, 0.0  ;;  %v1840_v61 = vmul.f32 0.2, %v2291_v59 }
 0x31b   : > { %1855 = vst.msk [vmem:[%s2742_s15 + $0x18] sm:$0xff] %vm1851_vm0, %v1849_v60 }
 0x31c   : > { %v1845_v62 = vsel %vm1835_vm4, %v2291_v59, %v1840_v61 }
 0x31d   : > { %v1850_v63 = vmul.f32 %v1845_v62, %v2517_v57 }
 0x31f   : > { %1857 = vst.msk [vmem:[%s2742_s15 + $0x20] sm:$0xf] %vm1856_vm5, %v1850_v63 }
 0x320 PF: > { %s20_s13 = sadd.s32 1, %s2323_s13  }
 0x321   : > { %p17_p4 = scmp.ge.s32.totalorder %s20_s13, 4  }
 0x323   :  { %19 = sbr.rel (!%p17_p4) target bundleno = 1 (0x1), region = 98 }

</bundles_post_ra>
